<compile_context>
chip_gen: v6e
topology: v6e:2x2x1
jax: 0.10.0
libtpu: 0.0.40
codegen_flags: <defaults>
</compile_context>

<pallas_src>
import functools
import math

import jax
import jax.numpy as jnp
from jax.experimental import pallas as pl
from jax.experimental.pallas import tpu as pltpu


# Finite "-inf": keeps the online-softmax NaN-safe even for fully-masked rows
# inside a diagonal block (kv block 0 is always processed, so l > 0 for every row).
_MASK_VALUE = -0.7 * float(jnp.finfo(jnp.float32).max)


# ----------------------------------------------------------------------------
# helpers
# ----------------------------------------------------------------------------
def _pick_tile(dim, target, aligns):
    """Largest tile <= target that divides `dim`, trying alignments in order.
    Falls back to the full dimension (a full-extent block is always legal)."""
    if dim <= target:
        return dim
    for align in aligns:
        t = (target // align) * align
        while t >= align:
            if dim % t == 0:
                return t
            t -= align
    return dim


# ----------------------------------------------------------------------------
# Tiled linear kernel: y = x @ W   (W already [K, N], transposed once outside)
# ----------------------------------------------------------------------------
def _matmul_kernel(x_ref, w_ref, o_ref, acc_ref):
    @pl.when(pl.program_id(2) == 0)
    def _():
        acc_ref[...] = jnp.zeros_like(acc_ref)

    acc_ref[...] += jnp.dot(x_ref[...], w_ref[...],
                            preferred_element_type=jnp.float32)

    @pl.when(pl.program_id(2) == pl.num_programs(2) - 1)
    def _():
        o_ref[...] = acc_ref[...].astype(o_ref.dtype)


def linear_no_bias(x2d, weight_t):
    """x2d: [M, K], weight_t: [K, N] (pre-transposed nn.Linear weight) -> [M, N]."""
    M, K = x2d.shape
    K2, N = weight_t.shape
    assert K == K2
    itemsize = x2d.dtype.itemsize
    sub = 16 if itemsize == 2 else 8                 # bf16 packs 2 rows / sublane
    tm = _pick_tile(M, 512, (sub,))
    tn = _pick_tile(N, 512, (128, sub))
    tk = _pick_tile(K, 1024 if itemsize == 2 else 512, (128, sub))
    grid = (M // tm, N // tn, K // tk)

    # double-buffered in/out blocks + f32 accumulator, 2x headroom,
    # capped at 48 MiB (safe under v7x's 64 MiB physical VMEM).
    vmem_need = (2 * (tm * tk + tk * tn) + 2 * tm * tn) * itemsize + tm * tn * 4
    vmem_limit = int(min(48 * 2**20, max(2 * vmem_need, 16 * 2**20)))

    return pl.pallas_call(
        _matmul_kernel,
        out_shape=jax.ShapeDtypeStruct((M, N), x2d.dtype),
        grid=grid,
        in_specs=[
            pl.BlockSpec((tm, tk), lambda i, j, k: (i, k)),
            pl.BlockSpec((tk, tn), lambda i, j, k: (k, j)),
        ],
        out_specs=pl.BlockSpec((tm, tn), lambda i, j, k: (i, j)),
        scratch_shapes=[pltpu.VMEM((tm, tn), jnp.float32)],
        compiler_params=pltpu.CompilerParams(
            dimension_semantics=("parallel", "parallel", "arbitrary"),
            vmem_limit_bytes=vmem_limit),
        cost_estimate=pl.CostEstimate(
            flops=int(2 * M * N * K),
            transcendentals=0,
            bytes_accessed=int((M * K + K * N + M * N) * itemsize)),
    )(x2d, weight_t)


# ----------------------------------------------------------------------------
# Flash (online-softmax) causal attention kernel.
# Grid = (B, Hp, q-tiles, kv-tiles); kv axis innermost / "arbitrary".
# Kernel refs are always 2-D: q (tq, d), k/v (tkv, d), out (tq, d).
# ----------------------------------------------------------------------------
def _flash_attn_kernel(q_ref, k_ref, v_ref, o_ref, m_ref, l_ref, acc_ref,
                       *, block_q, block_kv):
    qi = pl.program_id(2)
    ki = pl.program_id(3)
    q_start = qi * block_q
    k_start = ki * block_kv

    @pl.when(ki == 0)
    def _():
        m_ref[...] = jnp.full_like(m_ref, _MASK_VALUE)
        l_ref[...] = jnp.zeros_like(l_ref)
        acc_ref[...] = jnp.zeros_like(acc_ref)

    def scores():
        # q @ k.T on the MXU (inputs in native dtype, f32 accumulate). The
        # softmax scale is already folded into the q columns of the QKV weight.
        return jax.lax.dot_general(q_ref[...], k_ref[...],
                                   (((1,), (1,)), ((), ())),
                                   preferred_element_type=jnp.float32)

    def online_update(s):
        m_prev = m_ref[...]
        m_new = jnp.maximum(m_prev, jnp.max(s, axis=-1, keepdims=True))
        alpha = jnp.exp(m_prev - m_new)
        p = jnp.exp(s - m_new)
        l_ref[...] = alpha * l_ref[...] + jnp.sum(p, axis=-1, keepdims=True)
        acc_ref[...] = alpha * acc_ref[...] + jnp.dot(
            p.astype(v_ref.dtype), v_ref[...], preferred_element_type=jnp.float32)
        m_ref[...] = m_new

    # Block fully at/below the diagonal: no masking arithmetic at all.
    @pl.when(k_start + block_kv - 1 <= q_start)
    def _():
        online_update(scores())

    # Block straddling the diagonal: mask, then update.
    @pl.when(jnp.logical_and(k_start + block_kv - 1 > q_start,
                             k_start <= q_start + block_q - 1))
    def _():
        s = scores()
        row = q_start + jax.lax.broadcasted_iota(jnp.int32, s.shape, 0)
        col = k_start + jax.lax.broadcasted_iota(jnp.int32, s.shape, 1)
        online_update(jnp.where(col <= row, s, _MASK_VALUE))

    # Blocks strictly above the diagonal are skipped entirely; their K/V DMA is
    # also elided because the clamped index_map re-requests the previous block.

    @pl.when(ki == pl.num_programs(3) - 1)
    def _():
        inv_l = pl.reciprocal(l_ref[...], approx=False)   # exact: runs once per q tile
        o_ref[...] = (acc_ref[...] * inv_l).astype(o_ref.dtype)


def _flash_call(operands, in_specs, out_spec, out_shape, grid, tq, tkv, d):
    B, Hp, nq, nkv = grid
    S = nq * tq
    dtype = operands[0].dtype
    itemsize = dtype.itemsize
    kernel = functools.partial(_flash_attn_kernel, block_q=tq, block_kv=tkv)

    vmem_need = ((2 * tq * d + 4 * tkv * d + 2 * tq * d) * itemsize
                 + (tq * d + 2 * tq) * 4)
    vmem_limit = int(min(48 * 2**20, max(4 * vmem_need, 16 * 2**20)))

    # causal: each q tile streams ~ (S + tq)/2 kv rows on average (k and v).
    kv_bytes = 2 * B * Hp * nq * ((S + tq) // 2) * d * itemsize
    qo_bytes = 2 * B * Hp * S * d * itemsize

    return pl.pallas_call(
        kernel,
        out_shape=out_shape,
        grid=grid,
        in_specs=in_specs,
        out_specs=out_spec,
        scratch_shapes=[
            pltpu.VMEM((tq, 1), jnp.float32),    # running max m
            pltpu.VMEM((tq, 1), jnp.float32),    # running denom l
            pltpu.VMEM((tq, d), jnp.float32),    # running accumulator
        ],
        compiler_params=pltpu.CompilerParams(
            dimension_semantics=("parallel", "parallel", "parallel", "arbitrary"),
            vmem_limit_bytes=vmem_limit),
        cost_estimate=pl.CostEstimate(
            flops=int(2 * B * Hp * S * S * d),          # causal ~ half of 4*S^2*d
            transcendentals=int(B * Hp * S * S // 2),
            bytes_accessed=int(qo_bytes + kv_bytes)),
    )(*operands)


def _attn_tiles(S, itemsize):
    sub = 16 if itemsize == 2 else 8
    tq = _pick_tile(S, 128, (128, sub))    # bound f32 s-tile / vreg pressure
    tkv = _pick_tile(S, 256, (128, sub))   # fill the 256-wide MXU on v6e/v7x
    return tq, tkv


def flash_attention_from_slab(qkv, *, B, S, Hp, d):
    """Fast path. qkv: [B*S, 3*Hp*d] with per-head contiguous (q,k,v) columns.
    Returns ctx: [B*S, Hp*d]. Requires d % 128 == 0 (lane-aligned column blocks)."""
    tq, tkv = _attn_tiles(S, qkv.dtype.itemsize)
    nq, nkv = S // tq, S // tkv

    def kv_clamp(i, j):
        # Clamp upper-triangle requests to the last needed block so the block
        # index repeats and Pallas elides the K/V DMA for skipped steps.
        return jnp.minimum(j, ((i + 1) * tq - 1) // tkv)

    q_spec = pl.BlockSpec((tq, d), lambda b, h, i, j: (b * nq + i, 3 * h))
    k_spec = pl.BlockSpec(
        (tkv, d), lambda b, h, i, j: (b * nkv + kv_clamp(i, j), 3 * h + 1))
    v_spec = pl.BlockSpec(
        (tkv, d), lambda b, h, i, j: (b * nkv + kv_clamp(i, j), 3 * h + 2))
    o_spec = pl.BlockSpec((tq, d), lambda b, h, i, j: (b * nq + i, h))

    out_shape = jax.ShapeDtypeStruct((B * S, Hp * d), qkv.dtype)
    return _flash_call((qkv, qkv, qkv), [q_spec, k_spec, v_spec], o_spec,
                       out_shape, (B, Hp, nq, nkv), tq, tkv, d)


def flash_attention_bhsd(q, k, v):
    """Fallback path. q, k, v: [B, Hp, S, d] -> [B, Hp, S, d]."""
    B, Hp, S, d = q.shape
    tq, tkv = _attn_tiles(S, q.dtype.itemsize)
    nq, nkv = S // tq, S // tkv

    def kv_clamp(i, j):
        return jnp.minimum(j, ((i + 1) * tq - 1) // tkv)

    q_spec = pl.BlockSpec((None, None, tq, d), lambda b, h, i, j: (b, h, i, 0))
    kv_spec = pl.BlockSpec((None, None, tkv, d),
                           lambda b, h, i, j: (b, h, kv_clamp(i, j), 0))
    o_spec = pl.BlockSpec((None, None, tq, d), lambda b, h, i, j: (b, h, i, 0))

    out_shape = jax.ShapeDtypeStruct((B, Hp, S, d), q.dtype)
    return _flash_call((q, k, v), [q_spec, kv_spec, kv_spec], o_spec,
                       out_shape, (B, Hp, nq, nkv), tq, tkv, d)


# ----------------------------------------------------------------------------
# Module wrapper (parameters initialized deterministically in-script)
# ----------------------------------------------------------------------------
class MegatronFlashAttenPallas:
    def __init__(self, *, hidden_size, num_attention_heads, tp=1,
                 dtype=jnp.float32, key=None):
        assert hidden_size % tp == 0 and num_attention_heads % tp == 0
        assert hidden_size % num_attention_heads == 0
        self.tp = tp
        self.hidden_size = hidden_size
        self.hidden_size_per_partition = hidden_size // tp
        self.num_attention_heads_per_partition = num_attention_heads // tp
        self.hidden_size_per_attention_head = hidden_size // num_attention_heads

        if key is None:
            key = jax.random.PRNGKey(0)
        k1, k2 = jax.random.split(key)
        # torch.rand -> uniform [0, 1); torch nn.Linear convention weight = [out, in]
        self.atten_weight_1 = jax.random.uniform(
            k1, (3 * hidden_size // tp, hidden_size), dtype=jnp.float32).astype(dtype)
        self.atten_linear_weight = jax.random.uniform(
            k2, (hidden_size, self.hidden_size_per_partition),
            dtype=jnp.float32).astype(dtype)

        Hp = self.num_attention_heads_per_partition
        d = self.hidden_size_per_attention_head
        # Pre-transpose ONCE (kernels consume [K, N]) and fold the 1/sqrt(d)
        # softmax scale into the per-head q columns (removes a per-kv-step VPU
        # multiply from the attention kernel).
        col_scale = jnp.ones((Hp, 3, d), jnp.float32).at[:, 0, :].set(
            1.0 / math.sqrt(d)).reshape(-1)
        w1_t = self.atten_weight_1.astype(jnp.float32).T * col_scale[None, :]
        self.atten_weight_1_t = w1_t.astype(dtype)
        self.atten_linear_weight_t = jnp.asarray(self.atten_linear_weight.T)

    def __call__(self, hidden_state):
        # hidden_state: [S, B, H]  (Megatron seq-first layout)
        S, B, H = hidden_state.shape
        Hp = self.num_attention_heads_per_partition
        d = self.hidden_size_per_attention_head

        # One hidden-sized relayout to batch-major (cheaper than transposing the
        # 3x-larger qkv tensor after the projection).
        x = jnp.transpose(hidden_state, (1, 0, 2)).reshape(B * S, H)

        # QKV projection; columns are per-head contiguous (q, k, v) slices of d.
        qkv = linear_no_bias(x, self.atten_weight_1_t)            # [B*S, 3*H/tp]

        if d % 128 == 0:
            # Fast path: attention reads q/k/v straight out of the matmul slab and
            # writes ctx straight into the second matmul's input slab -> no HBM
            # transposes between the three Pallas kernels.
            ctx = flash_attention_from_slab(qkv, B=B, S=S, Hp=Hp, d=d)
        else:
            # TODO(synk): head_dim not lane-aligned (d % 128 != 0) -> explicit
            # relayout so attention blocks keep d as a full-extent last dim.
            q, k, v = jnp.transpose(qkv.reshape(B, S, Hp, 3, d), (3, 0, 2, 1, 4))
            ctx = flash_attention_bhsd(q, k, v)                    # [B, Hp, S, d]
            ctx = jnp.transpose(ctx, (0, 2, 1, 3)).reshape(B * S, Hp * d)

        # output projection (tiled Pallas matmul), then back to seq-first layout
        out = linear_no_bias(ctx, self.atten_linear_weight_t)      # [B*S, H]
        return jnp.transpose(out.reshape(B, S, H), (1, 0, 2))      # [S, B, H]


# ----------------------------------------------------------------------------
# Pure-JAX reference (high precision) for correctness checking
# ----------------------------------------------------------------------------
def _reference_forward(model, hidden_state):
    hp = jax.lax.Precision.HIGHEST
    S, B, H = hidden_state.shape
    Hp = model.num_attention_heads_per_partition
    d = model.hidden_size_per_attention_head
    w1 = model.atten_weight_1.astype(jnp.float32)
    w2 = model.atten_linear_weight.astype(jnp.float32)
    qkv = jnp.matmul(hidden_state.astype(jnp.float32), w1.T, precision=hp)
    qkv = qkv.reshape(S, B, Hp, 3, d)
    q, k, v = qkv[..., 0, :], qkv[..., 1, :], qkv[..., 2, :]
    q, k, v = (jnp.transpose(t, (1, 2, 0, 3)) for t in (q, k, v))   # [B, Hp, S, d]
    s = jnp.einsum("bhqd,bhkd->bhqk", q, k, precision=hp) / math.sqrt(d)
    mask = jnp.tril(jnp.ones((S, S), dtype=bool))
    s = jnp.where(mask, s, -jnp.inf)
    p = jax.nn.softmax(s, axis=-1)
    ctx = jnp.einsum("bhqk,bhkd->bhqd", p, v, precision=hp)
    ctx = jnp.transpose(ctx, (2, 0, 1, 3)).reshape(S, B, Hp * d)
    return jnp.matmul(ctx, w2.T, precision=hp)


if __name__ == "__main__":
    def run_case(seq_len, micro_batch, hidden_size, num_heads):
        key = jax.random.PRNGKey(0)
        k_in, k_w = jax.random.split(key)
        model = MegatronFlashAttenPallas(
            hidden_size=hidden_size, num_attention_heads=num_heads,
            tp=1, dtype=jnp.float32, key=k_w)
        # small-magnitude inputs keep softmax scores well-conditioned for the check
        hidden_state = 0.05 * jax.random.normal(
            k_in, (seq_len, micro_batch, hidden_size), dtype=jnp.float32)

        out = jax.block_until_ready(model(hidden_state))
        assert out.shape == (seq_len, micro_batch, hidden_size)

        ref = _reference_forward(model, hidden_state)
        err = float(jnp.max(jnp.abs(out - ref)))
        scale = float(jnp.max(jnp.abs(ref))) + 1e-6
        assert err <= 2e-3 * scale, f"max abs err {err} vs ref scale {scale}"

    # head_dim = 128 -> fused fast path (no HBM relayout between kernels)
    run_case(seq_len=16, micro_batch=2, hidden_size=256, num_heads=2)
    # head_dim = 8   -> fallback path (explicit relayout, full-extent lane blocks)
    run_case(seq_len=16, micro_batch=2, hidden_size=32, num_heads=4)

    print("KERNEL_OK")
</pallas_src>

<mosaic_0001>
module attributes {stable_mosaic.version = 11 : i64} {
  func.func @_matmul_kernel(%arg0: i32, %arg1: i32, %arg2: i32, %arg3: memref<32x256xf32, #tpu.memory_space<vmem>>, %arg4: memref<256x384xf32, #tpu.memory_space<vmem>>, %arg5: memref<32x384xf32, #tpu.memory_space<vmem>>, %arg6: memref<32x384xf32, #tpu.memory_space<vmem>>) attributes {dimension_semantics = [#tpu.dimension_semantics<parallel>, #tpu.dimension_semantics<parallel>, #tpu.dimension_semantics<arbitrary>], iteration_bounds = array<i64: 1, 2, 1>, scalar_prefetch = 0 : i64, scratch_operands = 1 : i64, tpu.core_type = #tpu.core_type<tc>, window_params = [{transform_indices = @transform_0, window_bounds = array<i64: 32, 256>}, {transform_indices = @transform_1, window_bounds = array<i64: 256, 384>}, {transform_indices = @transform_2, window_bounds = array<i64: 32, 384>}]} {
    %c0_i32 = arith.constant 0 : i32
    %0 = arith.cmpi eq, %arg2, %c0_i32 : i32
    %1 = arith.extui %0 : i1 to i32
    %c0_i32_0 = arith.constant 0 : i32
    %2 = arith.cmpi ne, %1, %c0_i32_0 : i32
    scf.if %2 {
      %cst_10 = arith.constant 0.000000e+00 : f32
      %12 = vector.broadcast %cst_10 : f32 to vector<32x384xf32>
      %c0_11 = arith.constant 0 : index
      %c0_12 = arith.constant 0 : index
      %13 = vector.load %arg6[%c0_11, %c0_12] : memref<32x384xf32, #tpu.memory_space<vmem>>, vector<32x384xf32>
      tpu.vector_store %arg6[%c0_11, %c0_12], %12 {strides = array<i32>} : memref<32x384xf32, #tpu.memory_space<vmem>>, vector<32x384xf32>,
    } else {
    }
    %c0 = arith.constant 0 : index
    %c0_1 = arith.constant 0 : index
    %3 = vector.load %arg6[%c0, %c0_1] : memref<32x384xf32, #tpu.memory_space<vmem>>, vector<32x384xf32>
    %c0_2 = arith.constant 0 : index
    %c0_3 = arith.constant 0 : index
    %4 = vector.load %arg3[%c0_2, %c0_3] : memref<32x256xf32, #tpu.memory_space<vmem>>, vector<32x256xf32>
    %c0_4 = arith.constant 0 : index
    %c0_5 = arith.constant 0 : index
    %5 = vector.load %arg4[%c0_4, %c0_5] : memref<256x384xf32, #tpu.memory_space<vmem>>, vector<256x384xf32>
    %cst = arith.constant dense<0.000000e+00> : vector<32x384xf32>
    %6 = tpu.matmul %4, %5, %cst {dimension_numbers = #tpu.dot_dimension_numbers<[1], [0], [0], [1], [0, 0, 1, 1], [], []>} : vector<32x256xf32>, vector<256x384xf32>, vector<32x384xf32> -> vector<32x384xf32>
    %7 = arith.addf %3, %6 : vector<32x384xf32>
    %c0_6 = arith.constant 0 : index
    %c0_7 = arith.constant 0 : index
    %8 = vector.load %arg6[%c0_6, %c0_7] : memref<32x384xf32, #tpu.memory_space<vmem>>, vector<32x384xf32>
    tpu.vector_store %arg6[%c0_6, %c0_7], %7 {strides = array<i32>} : memref<32x384xf32, #tpu.memory_space<vmem>>, vector<32x384xf32>,
    %c0_i32_8 = arith.constant 0 : i32
    %9 = arith.cmpi eq, %arg2, %c0_i32_8 : i32
    %10 = arith.extui %9 : i1 to i32
    %c0_i32_9 = arith.constant 0 : i32
    %11 = arith.cmpi ne, %10, %c0_i32_9 : i32
    scf.if %11 {
      %c0_10 = arith.constant 0 : index
      %c0_11 = arith.constant 0 : index
      %12 = vector.load %arg6[%c0_10, %c0_11] : memref<32x384xf32, #tpu.memory_space<vmem>>, vector<32x384xf32>
      %c0_12 = arith.constant 0 : index
      %c0_13 = arith.constant 0 : index
      %13 = vector.load %arg5[%c0_12, %c0_13] : memref<32x384xf32, #tpu.memory_space<vmem>>, vector<32x384xf32>
      tpu.vector_store %arg5[%c0_12, %c0_13], %12 {strides = array<i32>} : memref<32x384xf32, #tpu.memory_space<vmem>>, vector<32x384xf32>,
    } else {
    }
    return
  }
  func.func @transform_0(%arg0: i32, %arg1: i32, %arg2: i32) -> (i32, i32) {
    %c0_i32 = arith.constant 0 : i32
    return %arg0, %arg2 : i32, i32
  }
  func.func @transform_1(%arg0: i32, %arg1: i32, %arg2: i32) -> (i32, i32) {
    %c0_i32 = arith.constant 0 : i32
    return %arg2, %arg1 : i32, i32
  }
  func.func @transform_2(%arg0: i32, %arg1: i32, %arg2: i32) -> (i32, i32) {
    %c0_i32 = arith.constant 0 : i32
    return %arg0, %arg1 : i32, i32
  }
}

</mosaic_0001>

<bundles_post_ra>
// kernel: tpu_custom_call.1
= control target key start
LH: loop header
LB: loop body
LE: loop exit
PB: predicated region body
PF: predicated region fallthrough
CT: control target
= control target key end

     0   :  { %7 = vsyncpa [#allocation4], 0  ;;  %s1307_s0 = inlined_call_operand.hbm [shape: f32[32,256], index: 0, kind: input, shape index: {}]   ;;  %s1308_s1 = inlined_call_operand.hbm [shape: f32[256,768], index: 1, kind: input, shape index: {}]   ;;  %s1309_s2 = inlined_call_operand.hbm [shape: f32[32,768], index: 2, kind: output, shape index: {}]  }
   0x1   :  { %8 = vsyncpa [#allocation7], 0 }
   0x2   :  { %10 = vsyncpa [#allocation7 + $0x1], 0 }
   0x3   :  { %11 = vsyncpa [#allocation5], 0 }
   0x4   :  { %13 = vsyncpa [#allocation5 + $0x1], 0  ;;  %s1010_s9 = smov 0   ;;  %s1012_s10 = smov 0  }
   0x5   :  { %s1014_s11 = smov 0   ;;  %s1016_s12 = smov 0  }
   0x6   :  { %s1018_s13 = smov 0   ;;  %s1020_s14 = smov 0  }
   0x7 LB: > { %1317 = sst [smem:[#allocation12_spill]] %s982_s14  ;;  %s703_s15 = sadd.s32 4294967295, %s982_s14   ;;  %s982_s14 = sphi %s1020_s14, %s19_s14   ;;  %s978_s13 = sphi %s1018_s13, %s1340_s13   ;;  %s974_s12 = sphi %s1016_s12, %s1339_s12   ;;  %s970_s11 = sphi %s1014_s11, %s1338_s11   ;;  %s966_s10 = sphi %s1012_s10, %s1337_s10   ;;  %s962_s9 = sphi %s1010_s9, %s1336_s9  }
   0x8   : > { %s704_s16 = sadd.s32 4294967294, %s982_s14   ;;  %p82_p0 = scmp.ne.s32.totalorder %s970_s11, %s966_s10 }
   0x9   : > { %p83_p1 = scmp.eq.s32.totalorder %s982_s14, 0  ;;  %p88_p2 = scmp.ne.s32.totalorder %s966_s10, %s962_s9 }
   0xa   : > { %p1048_p3 = scmp.eq.s32.totalorder %s703_s15, 0  ;;  %p114_p4 = scmp.eq.s32.totalorder %s703_s15, 1 }
   0xb   : > { %p1052_p5 = por %p83_p1, %p82_p0  ;;  %p120_p6 = scmp.eq.s32.totalorder %s704_s16, 1 }
   0xc   : > { %s1318_s18 = scalar_select %p1048_p3, 1, 0 }
   0xd   : > { %p1058_p7 = por %p1048_p3, %p88_p2  ;;  %p1062_p8 = por %p114_p4, %p82_p0 }
   0xe   : > { %p1066_p9 = por %p120_p6, %p88_p2  ;;  %p705_p10 = scmp.ge.s32.totalorder %s982_s14, 1 }
   0xf   : > { %s1320_s20 = scalar_select %p1058_p7, 1, 0 }
  0x10   : > { %s1321_s21 = scalar_select %p1062_p8, 1, 0 }
  0x11   : > { %s1322_s22 = scalar_select %p1066_p9, 1, 0 }
  0x12   : > { %p127_p11 = scmp.lt.s32.totalorder %s982_s14, 3  ;;  %s984_s24 = smov [#allocation3]  }
  0x13   : > { %1323 = sst [smem:[#allocation13_spill]] %s1322_s22  ;;  %s145_s25 = sshll.u32 %s984_s24, 4  ;;  %s146_s25 = int_to_ptr.vmem [resolvable:$true] %s145_s25 }
  0x14   : > { %p1072_p12 = pnand %p705_p10, %p127_p11  ;;  %p784_p1 = scmp.lt.s32.totalorder %s982_s14, 2 }
  0x15   : > { %s34_s28 = sadd.s32 1, %s978_s13  ;;  %s855_s30 = scalar_lea.vmem %s146_s25, 1024 }
  0x16   : > { %p771_p13 = pneg %p1072_p12  ;;  %p1088_p2 = pnand %p784_p1, %p1052_p5 }
  0x17   : > { %p1093_p6 = scmp.ge.s32.totalorder %s34_s28, 2  ;;  %p856_p11 = scmp.ne.s32.totalorder %s146_s25, %s855_s30 }
  0x18   : > { %p1082_p4 = pnand %p771_p13, %p1048_p3  ;;  %p863_p9 = scmp.lt.s32.totalorder %s146_s25, %s146_s25 }
  0x19   : > { %p864_p8 = scmp.lt.s32.totalorder %s855_s30, %s855_s30 }
  0x1a   : > { %p846_p10 = pneg %p1082_p4 }
  0x1b   : > { %p865_p7 = por %p864_p8, %p863_p9 }
  0x1c   : > { %p858_p0 = pnand %p856_p11, %p846_p10 }
  0x1e   : > { %p859_p13 = pneg %p858_p0 }
  0x20   : > { %p866_p3 = pnand %p865_p7, %p859_p13 }
  0x22   : > { %869 = shalt.err (!%p866_p3)
}
  0x23   : > { %s985_s3 = smov 256   ;;  %s986_s4 = smov 16  }
  0x24   : > { %774 = dma.hbm_to_vmem [thread:$0]  (!%p1082_p4), %s1307_s0, 1024, %s146_s25, [#allocation4], %s985_s3, %s985_s3, %s986_s4  }
  0x25   : > { %s159_s7 = sand.u32 1, %s970_s11   ;;  %s1342_s28 = smov (%p1093_p6, %s34_s28), 0 }
  0x26   : > { %s760_s8 = smul.u32 768, %s159_s7  ;;  %s71_s15 = ssub.s32 %s978_s13, %s1342_s28 }
  0x27   : > { %s714_s16 = smul.u32 384, %s978_s13  ;;  %p73_p3 = scmp.eq.s32.totalorder %s71_s15, 0 }
  0x28   : > { %s163_s17 = scalar_lea.vmem [#allocation6], %s760_s8  ;;  %s1328_s26 = sadd.s32 1, %s970_s11 }
  0x29   : > { %s172_s30 = scalar_lea.hbm %s1308_s1, %s714_s16  ;;  %s173_s14 = sshll.u32 %s163_s17, 4  ;;  %s174_s14 = int_to_ptr.vmem [resolvable:$true] %s173_s14 }
  0x2a   : > { %s1118_s22 = scalar_select %p73_p3, %s970_s11, %s1328_s26  }
  0x2b   : > { %s160_s25 = scalar_lea.sflag [#allocation7], %s159_s7  ;;  %p872_p5 = pneg %p1088_p2 }
  0x2c   : > { %s883_s29 = scalar_lea.vmem %s174_s14, 12288  ;;  %s987_s3 = smov [#allocation6]  }
  0x2d   : > { %p884_p7 = scmp.ne.s32.totalorder %s174_s14, %s883_s29  ;;  %s888_s4 = sshll.u32 %s987_s3, 4  ;;  %s889_s4 = int_to_ptr.vmem [resolvable:$false] %s888_s4 }
  0x2e   : > { %s890_s5 = scalar_lea.vmem %s889_s4, 24576  ;;  %p891_p0 = scmp.lt.s32.totalorder %s174_s14, %s889_s4 }
  0x2f   : > { %p886_p8 = pnand %p884_p7, %p872_p5  ;;  %p892_p1 = scmp.lt.s32.totalorder %s890_s5, %s883_s29 }
  0x31   : > { %p887_p9 = pneg %p886_p8  ;;  %p893_p4 = por %p892_p1, %p891_p0 }
  0x33   : > { %p894_p6 = pnand %p893_p4, %p887_p9 }
  0x35   : > { %897 = shalt.err (!%p894_p6)
}
  0x36   : > { %s988_s17 = smov 768   ;;  %s989_s6 = smov 384  }
  0x37   : > { %s990_s8 = smov 24   ;;  %185 = sbr.rel (%p1072_p12) target bundleno = 353 (0x161), region = 28 }
  0x38   : > { %778 = dma.hbm_to_vmem [thread:$0]  (!%p1088_p2), %s172_s30, 12288, %s174_s14, %s160_s25, %s988_s17, %s989_s6, %s990_s8  }
  0x39   : > { %p1329_p10 = scmp.ne.s32.totalorder (!%p1072_p12), %s1318_s18, 0 }
  0x3c   : > { %949 = dma.done.wait (%p1329_p10), [#allocation4], 1024  }
  0x3d   : > { %951 = vsyncadd (%p1329_p10), [#allocation4], 4294966272  ;;  %s1131_s7 = sand.u32 1, %s966_s10   ;;  %p1330_p2 = scmp.ne.s32.totalorder %s1320_s20, 0 }
  0x3e   : > { %s761_s15 = smul.u32 768, %s1131_s7  ;;  %s192_s16 = scalar_lea.sflag [#allocation7], %s1131_s7 }
  0x40   : > { %s1135_s19 = scalar_lea.vmem [#allocation6], %s761_s15 }
  0x41   : > { %953 = dma.done.wait (%p1330_p2), %s192_s16, 12288  }
  0x42   : > { %955 = vsyncadd (%p1330_p2), %s192_s16, 4294955008  ;;  %v304_v0 = vld [vmem:[%s1135_s19 + $0x170] sm:$0xff]  ;;  %v303_v1 = vld [vmem:[%s1135_s19 + $0x168] sm:$0xff]  ;;  %s762_s14 = smul.u32 96, %s1131_s7  ;;  %p1331_p11 = scmp.ne.s32.totalorder %s1321_s21, 0 }
  0x43   : > { %v301_v2 = vld [vmem:[%s1135_s19 + $0x158] sm:$0xff]  ;;  %354 = vmatprep.subr.mxu0 %v304_v0  ;;  %v300_v3 = vld [vmem:[%s1135_s19 + $0x150] sm:$0xff]  ;;  %v298_v4 = vld [vmem:[%s1135_s19 + $0x140] sm:$0xff]  ;;  %s715_s20 = smul.u32 384, %s974_s12  ;;  %s580_s12 = scalar_lea.sflag [#allocation5], %s1131_s7 }
  0x44   : > { %355 = vmatpush1.msra.mxu0 %v303_v1  ;;  %v297_v5 = vld [vmem:[%s1135_s19 + $0x138] sm:$0xff]  ;;  %v295_v6 = vld [vmem:[%s1135_s19 + $0x128] sm:$0xff]  ;;  %v294_v7 = vld [vmem:[%s1135_s19 + $0x120] sm:$0xff]  ;;  %s1238_s18 = scalar_lea.vmem [#allocation8], %s762_s14  ;;  %s991_s25 = smov [#allocation8]  }
  0x45   : > { %356 = vmatprep.subr.mxu0 %v301_v2  ;;  %v292_v8 = vld [vmem:[%s1135_s19 + $0x110] sm:$0xff]  ;;  %v291_v9 = vld [vmem:[%s1135_s19 + $0x108] sm:$0xff]  ;;  %v289_v10 = vld [vmem:[%s1135_s19 + $0xf8] sm:$0xff]  ;;  %s596_s23 = sshll.u32 %s1238_s18, 4  ;;  %s1255_s30 = scalar_lea.hbm %s1309_s2, %s715_s20  ;;  %s1257_s23 = int_to_ptr.vmem [resolvable:$true] %s596_s23 }
  0x46   : > { %357 = vmatpush1.msra.mxu0 %v300_v3  ;;  %v288_v11 = vld [vmem:[%s1135_s19 + $0xf0] sm:$0xff]  ;;  %v353_v12 = vld [vmem:[%s1135_s19 + $0x2f8] sm:$0xff]  ;;  %v286_v13 = vld [vmem:[%s1135_s19 + $0xe0] sm:$0xff]  ;;  %s898_s26 = scalar_lea.vmem %s1257_s23, 1536  ;;  %s902_s29 = sshll.u32 %s991_s25, 4  ;;  %s903_s29 = int_to_ptr.vmem [resolvable:$false] %s902_s29 }
  0x47   : > { %358 = vmatprep.subr.mxu0 %v298_v4  ;;  %716 = vmatprep.subr.mxu1 %v353_v12  ;;  %v305_v14 = vld [vmem:[%s1135_s19 + $0x178] sm:$0xff]  ;;  %v350_v16 = vld [vmem:[%s1135_s19 + $0x2e0] sm:$0xff]  ;;  %v283_v18 = vld [vmem:[%s1135_s19 + $0xc8] sm:$0xff]  ;;  %p899_p12 = scmp.ne.s32.totalorder %s1257_s23, %s898_s26  ;;  %s904_s3 = scalar_lea.vmem %s903_s29, 3072 }
  0x48   : > { %359 = vmatpush1.msra.mxu0 %v297_v5  ;;  %v285_v15 = vld [vmem:[%s1135_s19 + $0xd8] sm:$0xff]  ;;  %717 = vmatpush3.msra.mxu1 %v305_v14  ;;  %v302_v17 = vld [vmem:[%s1135_s19 + $0x160] sm:$0xff]  ;;  %v347_v19 = vld [vmem:[%s1135_s19 + $0x2c8] sm:$0xff]  ;;  %p905_p5 = scmp.lt.s32.totalorder %s1257_s23, %s903_s29  ;;  %p906_p7 = scmp.lt.s32.totalorder %s904_s3, %s898_s26 }
  0x49   : > { %360 = vmatprep.subr.mxu0 %v295_v6  ;;  %718 = vmatprep.subr.mxu1 %v350_v16  ;;  %v282_v20 = vld [vmem:[%s1135_s19 + $0xc0] sm:$0xff]  ;;  %v299_v21 = vld [vmem:[%s1135_s19 + $0x148] sm:$0xff]  ;;  %v344_v22 = vld [vmem:[%s1135_s19 + $0x2b0] sm:$0xff]  ;;  %p900_p13 = pnand %p899_p12, %p1331_p11 }
  0x4a   : > { %361 = vmatpush1.msra.mxu0 %v294_v7  ;;  %719 = vmatpush3.msra.mxu1 %v302_v17  ;;  %v280_v23 = vld [vmem:[%s1135_s19 + $0xb0] sm:$0xff]  ;;  %v279_v25 = vld [vmem:[%s1135_s19 + $0xa8] sm:$0xff]  ;;  %v341_v26 = vld [vmem:[%s1135_s19 + $0x298] sm:$0xff]  ;;  %p907_p8 = por %p906_p7, %p905_p5 }
  0x4b   : > { %362 = vmatprep.subr.mxu0 %v292_v8  ;;  %720 = vmatprep.subr.mxu1 %v347_v19  ;;  %v296_v24 = vld [vmem:[%s1135_s19 + $0x130] sm:$0xff]  ;;  %v277_v27 = vld [vmem:[%s1135_s19 + $0x98] sm:$0xff]  ;;  %v338_v30 = vld [vmem:[%s1135_s19 + $0x280] sm:$0xff]  ;;  %p901_p3 = pneg %p900_p13 }
  0x4c   : > { %363 = vmatpush1.msra.mxu0 %v291_v9  ;;  %721 = vmatpush3.msra.mxu1 %v299_v21  ;;  %v293_v28 = vld [vmem:[%s1135_s19 + $0x118] sm:$0xff]  ;;  %v276_v29 = vld [vmem:[%s1135_s19 + $0x90] sm:$0xff]  ;;  %v274_v31 = vld [vmem:[%s1135_s19 + $0x80] sm:$0xff] }
  0x4d   : > { %364 = vmatprep.subr.mxu0 %v289_v10  ;;  %722 = vmatprep.subr.mxu1 %v344_v22  ;;  %v290_v32 = vld [vmem:[%s1135_s19 + $0x100] sm:$0xff]  ;;  %v273_v33 = vld [vmem:[%s1135_s19 + $0x78] sm:$0xff]  ;;  %v335_v34 = vld [vmem:[%s1135_s19 + $0x268] sm:$0xff]  ;;  %p908_p9 = pnand %p907_p8, %p901_p3 }
  0x4e   : > { %365 = vmatpush1.msra.mxu0 %v288_v11  ;;  %723 = vmatpush3.msra.mxu1 %v296_v24  ;;  %v271_v35 = vld [vmem:[%s1135_s19 + $0x68] sm:$0xff]  ;;  %v270_v37 = vld [vmem:[%s1135_s19 + $0x60] sm:$0xff]  ;;  %v332_v38 = vld [vmem:[%s1135_s19 + $0x250] sm:$0xff] }
  0x4f   : > { %366 = vmatprep.subr.mxu0 %v286_v13  ;;  %724 = vmatprep.subr.mxu1 %v341_v26  ;;  %v287_v36 = vld [vmem:[%s1135_s19 + $0xe8] sm:$0xff]  ;;  %v268_v39 = vld [vmem:[%s1135_s19 + $0x50] sm:$0xff]  ;;  %v329_v42 = vld [vmem:[%s1135_s19 + $0x238] sm:$0xff] }
  0x50   : > { %367 = vmatpush1.msra.mxu0 %v285_v15  ;;  %725 = vmatpush3.msra.mxu1 %v293_v28  ;;  %v284_v40 = vld [vmem:[%s1135_s19 + $0xd0] sm:$0xff]  ;;  %v267_v41 = vld [vmem:[%s1135_s19 + $0x48] sm:$0xff]  ;;  %v265_v43 = vld [vmem:[%s1135_s19 + $0x38] sm:$0xff] }
  0x51   : > { %368 = vmatprep.subr.mxu0 %v283_v18  ;;  %726 = vmatprep.subr.mxu1 %v338_v30  ;;  %v281_v44 = vld [vmem:[%s1135_s19 + $0xb8] sm:$0xff]  ;;  %v264_v45 = vld [vmem:[%s1135_s19 + $0x30] sm:$0xff]  ;;  %v326_v46 = vld [vmem:[%s1135_s19 + $0x220] sm:$0xff] }
  0x52   : > { %369 = vmatpush1.msra.mxu0 %v282_v20  ;;  %727 = vmatpush3.msra.mxu1 %v290_v32  ;;  %v262_v47 = vld [vmem:[%s1135_s19 + $0x20] sm:$0xff]  ;;  %v261_v49 = vld [vmem:[%s1135_s19 + $0x18] sm:$0xff]  ;;  %v323_v50 = vld [vmem:[%s1135_s19 + $0x208] sm:$0xff] }
  0x53   : > { %370 = vmatprep.subr.mxu0 %v280_v23  ;;  %728 = vmatprep.subr.mxu1 %v335_v34  ;;  %v278_v48 = vld [vmem:[%s1135_s19 + $0xa0] sm:$0xff]  ;;  %v259_v51 = vld [vmem:[%s1135_s19 + $0x8] sm:$0xff]  ;;  %v320_v54 = vld [vmem:[%s1135_s19 + $0x1f0] sm:$0xff] }
  0x54   : > { %371 = vmatpush1.msra.mxu0 %v279_v25  ;;  %729 = vmatpush3.msra.mxu1 %v287_v36  ;;  %v275_v52 = vld [vmem:[%s1135_s19 + $0x88] sm:$0xff]  ;;  %v258_v53 = vld [vmem:[%s1135_s19] sm:$0xff]  ;;  %v352_v55 = vld [vmem:[%s1135_s19 + $0x2f0] sm:$0xff] }
  0x55   : > { %372 = vmatprep.subr.mxu0 %v277_v27  ;;  %730 = vmatprep.subr.mxu1 %v332_v38  ;;  %v272_v56 = vld [vmem:[%s1135_s19 + $0x70] sm:$0xff]  ;;  %v351_v57 = vld [vmem:[%s1135_s19 + $0x2e8] sm:$0xff]  ;;  %v317_v58 = vld [vmem:[%s1135_s19 + $0x1d8] sm:$0xff] }
  0x56   : > { %373 = vmatpush1.msra.mxu0 %v276_v29  ;;  %731 = vmatpush3.msra.mxu1 %v284_v40  ;;  %v349_v59 = vld [vmem:[%s1135_s19 + $0x2d8] sm:$0xff]  ;;  %v348_v61 = vld [vmem:[%s1135_s19 + $0x2d0] sm:$0xff]  ;;  %v314_v62 = vld [vmem:[%s1135_s19 + $0x1c0] sm:$0xff] }
  0x57   : > { %374 = vmatprep.subr.mxu0 %v274_v31  ;;  %732 = vmatprep.subr.mxu1 %v329_v42  ;;  %v269_v60 = vld [vmem:[%s1135_s19 + $0x58] sm:$0xff]  ;;  %v346_v63 = vld [vmem:[%s1135_s19 + $0x2c0] sm:$0xff]  ;;  %v311_v2 = vld [vmem:[%s1135_s19 + $0x1a8] sm:$0xff] }
  0x58   : > { %375 = vmatpush1.msra.mxu0 %v273_v33  ;;  %733 = vmatpush3.msra.mxu1 %v281_v44  ;;  %v266_v0 = vld [vmem:[%s1135_s19 + $0x40] sm:$0xff]  ;;  %v345_v1 = vld [vmem:[%s1135_s19 + $0x2b8] sm:$0xff]  ;;  %v343_v3 = vld [vmem:[%s1135_s19 + $0x2a8] sm:$0xff] }
  0x59   : > { %376 = vmatprep.subr.mxu0 %v271_v35  ;;  %734 = vmatprep.subr.mxu1 %v326_v46  ;;  %v263_v4 = vld [vmem:[%s1135_s19 + $0x28] sm:$0xff]  ;;  %v342_v5 = vld [vmem:[%s1135_s19 + $0x2a0] sm:$0xff]  ;;  %v308_v6 = vld [vmem:[%s1135_s19 + $0x190] sm:$0xff] }
  0x5a   : > { %377 = vmatpush1.msra.mxu0 %v270_v37  ;;  %735 = vmatpush3.msra.mxu1 %v278_v48  ;;  %v340_v7 = vld [vmem:[%s1135_s19 + $0x290] sm:$0xff]  ;;  %v339_v9 = vld [vmem:[%s1135_s19 + $0x288] sm:$0xff]  ;;  %v337_v11 = vld [vmem:[%s1135_s19 + $0x278] sm:$0xff] }
  0x5b   : > { %378 = vmatprep.subr.mxu0 %v268_v39  ;;  %736 = vmatprep.subr.mxu1 %v323_v50  ;;  %v260_v8 = vld [vmem:[%s1135_s19 + $0x10] sm:$0xff]  ;;  %v251_v10 = vld [vmem:[#allocation3 + $0x8] sm:$0xff]  ;;  %v250_v12 = vld [vmem:[#allocation3] sm:$0xff] }
  0x5c   : > { %379 = vmatpush1.msra.mxu0 %v267_v41  ;;  %737 = vmatpush3.msra.mxu1 %v275_v52  ;;  %v336_v13 = vld [vmem:[%s1135_s19 + $0x270] sm:$0xff]  ;;  %v334_v14 = vld [vmem:[%s1135_s19 + $0x260] sm:$0xff]  ;;  %v253_v15 = vld [vmem:[#allocation3 + $0x18] sm:$0xff] }
  0x5d   : > { %380 = vmatprep.subr.mxu0 %v265_v43  ;;  %738 = vmatprep.subr.mxu1 %v320_v54  ;;  %v333_v16 = vld [vmem:[%s1135_s19 + $0x258] sm:$0xff]  ;;  %v331_v17 = vld [vmem:[%s1135_s19 + $0x248] sm:$0xff]  ;;  %v252_v18 = vld [vmem:[#allocation3 + $0x10] sm:$0xff] }
  0x5e   : > { %381 = vmatpush1.msra.mxu0 %v264_v45  ;;  %739 = vmatpush3.msra.mxu1 %v272_v56  ;;  %v330_v19 = vld [vmem:[%s1135_s19 + $0x240] sm:$0xff]  ;;  %v255_v20 = vld [vmem:[#allocation3 + $0x28] sm:$0xff]  ;;  %v328_v21 = vld [vmem:[%s1135_s19 + $0x230] sm:$0xff] }
  0x5f   : > { %382 = vmatprep.subr.mxu0 %v262_v47  ;;  %740 = vmatprep.subr.mxu1 %v317_v58  ;;  %v327_v22 = vld [vmem:[%s1135_s19 + $0x228] sm:$0xff]  ;;  %v325_v23 = vld [vmem:[%s1135_s19 + $0x218] sm:$0xff]  ;;  %v254_v24 = vld [vmem:[#allocation3 + $0x20] sm:$0xff] }
  0x60   : > { %383 = vmatpush1.msra.mxu0 %v261_v49  ;;  %741 = vmatpush3.msra.mxu1 %v269_v60  ;;  %v324_v25 = vld [vmem:[%s1135_s19 + $0x210] sm:$0xff]  ;;  %v257_v26 = vld [vmem:[#allocation3 + $0x38] sm:$0xff]  ;;  %v322_v27 = vld [vmem:[%s1135_s19 + $0x200] sm:$0xff] }
  0x61   : > { %384 = vmatprep.subr.mxu0 %v259_v51  ;;  %742 = vmatprep.subr.mxu1 %v314_v62  ;;  %v321_v28 = vld [vmem:[%s1135_s19 + $0x1f8] sm:$0xff]  ;;  %v319_v29 = vld [vmem:[%s1135_s19 + $0x1e8] sm:$0xff]  ;;  %v256_v30 = vld [vmem:[#allocation3 + $0x30] sm:$0xff] }
  0x62   : > { %385 = vmatpush1.msra.mxu0 %v258_v53  ;;  %743 = vmatpush3.msra.mxu1 %v266_v0  ;;  %v318_v31 = vld [vmem:[%s1135_s19 + $0x1e0] sm:$0xff]  ;;  %v316_v32 = vld [vmem:[%s1135_s19 + $0x1d0] sm:$0xff]  ;;  %v315_v33 = vld [vmem:[%s1135_s19 + $0x1c8] sm:$0xff] }
  0x63   : > { %386 = vmatprep.subr.mxu0 %v352_v55  ;;  %744 = vmatprep.subr.mxu1 %v311_v2  ;;  %v313_v34 = vld [vmem:[%s1135_s19 + $0x1b8] sm:$0xff]  ;;  %v312_v35 = vld [vmem:[%s1135_s19 + $0x1b0] sm:$0xff]  ;;  %v310_v36 = vld [vmem:[%s1135_s19 + $0x1a0] sm:$0xff] }
  0x64   : > { %387 = vmatpush2.msra.mxu0 %v351_v57  ;;  %745 = vmatpush3.msra.mxu1 %v263_v4  ;;  %v309_v37 = vld [vmem:[%s1135_s19 + $0x198] sm:$0xff]  ;;  %v307_v38 = vld [vmem:[%s1135_s19 + $0x188] sm:$0xff]  ;;  %v306_v39 = vld [vmem:[%s1135_s19 + $0x180] sm:$0xff] }
  0x65   : > { %388 = vmatprep.subr.mxu0 %v349_v59  ;;  %746 = vmatprep.subr.mxu1 %v308_v6 }
  0x66   : > { %389 = vmatpush2.msra.mxu0 %v348_v61  ;;  %747 = vmatpush3.msra.mxu1 %v260_v8 }
  0x67   : > { %390 = vmatprep.subr.mxu0 %v346_v63  ;;  %507 = vmatprep.mubr.f32.mxu1 %v251_v10 }
  0x68   : > { %391 = vmatpush2.msra.mxu0 %v345_v1  ;;  %508 = vmatmul.mubr.f32.vlgmr.msra.gmra.mxu1 %v250_v12 }
  0x69   : > { %392 = vmatprep.subr.mxu0 %v343_v3  ;;  %418 = vmatprep.mubr.f32.mxu0 %v251_v10 }
  0x6a   : > { %393 = vmatpush2.msra.mxu0 %v342_v5  ;;  %512 = vmatprep.mubr.f32.mxu1 %v253_v15 }
  0x6b   : > { %394 = vmatprep.subr.mxu0 %v340_v7 }
  0x6c   : > { %395 = vmatpush2.msra.mxu0 %v339_v9  ;;  %513 = vmatmul.mubr.f32.gmra.mxu1 %v252_v18 }
  0x6d   : > { %396 = vmatprep.subr.mxu0 %v337_v11  ;;  %517 = vmatprep.mubr.f32.mxu1 %v255_v20 }
  0x6e   : > { %397 = vmatpush2.msra.mxu0 %v336_v13 }
  0x6f   : > { %398 = vmatprep.subr.mxu0 %v334_v14 }
  0x70   : > { %399 = vmatpush2.msra.mxu0 %v333_v16  ;;  %518 = vmatmul.mubr.f32.gmra.mxu1 %v254_v24 }
  0x71   : > { %400 = vmatprep.subr.mxu0 %v331_v17  ;;  %522 = vmatprep.mubr.f32.mxu1 %v257_v26 }
  0x72   : > { %401 = vmatpush2.msra.mxu0 %v330_v19 }
  0x73   : > { %402 = vmatprep.subr.mxu0 %v328_v21 }
  0x74   : > { %403 = vmatpush2.msra.mxu0 %v327_v22  ;;  %523 = vmatmul.mubr.f32.gmra.mxu1 %v256_v30 }
  0x75   : > { %404 = vmatprep.subr.mxu0 %v325_v23 }
  0x76   : > { %405 = vmatpush2.msra.mxu0 %v324_v25 }
  0x77   : > { %406 = vmatprep.subr.mxu0 %v322_v27 }
  0x78   : > { %407 = vmatpush2.msra.mxu0 %v321_v28 }
  0x79   : > { %408 = vmatprep.subr.mxu0 %v319_v29 }
  0x7a   : > { %409 = vmatpush2.msra.mxu0 %v318_v31 }
  0x7b   : > { %410 = vmatprep.subr.mxu0 %v316_v32 }
  0x7c   : > { %411 = vmatpush2.msra.mxu0 %v315_v33 }
  0x7d   : > { %412 = vmatprep.subr.mxu0 %v313_v34 }
  0x7e   : > { %413 = vmatpush2.msra.mxu0 %v312_v35 }
  0x7f   : > { %414 = vmatprep.subr.mxu0 %v310_v36 }
  0x80   : > { %415 = vmatpush2.msra.mxu0 %v309_v37 }
  0x81   : > { %416 = vmatprep.subr.mxu0 %v307_v38 }
  0x82   : > { %417 = vmatpush2.msra.mxu0 %v306_v39 }
  0x83   : > { %419 = vmatmul.mubr.f32.vlgmr.msra.gmra.mxu0 %v250_v12 }
  0x84   : > { %424 = vmatprep.mubr.f32.mxu0 %v253_v15 }
  0x87   : > { %425 = vmatmul.mubr.f32.gmra.mxu0 %v252_v18 }
  0x88   : > { %430 = vmatprep.mubr.f32.mxu0 %v255_v20 }
  0x8b   : > { %431 = vmatmul.mubr.f32.gmra.mxu0 %v254_v24 }
  0x8c   : > { %436 = vmatprep.mubr.f32.mxu0 %v257_v26 }
  0x8f   : > { %437 = vmatmul.mubr.f32.gmra.mxu0 %v256_v30 }
 0x128   : > { %v748_v40 = vpop.f32.mrf.mxu1 }
 0x12a   : > { %v749_v41 = vpop.f32.mrf.mxu1 }
 0x12b   : > { %v750_v42 = vadd.f32 %v749_v41, %v748_v40 }
 0x12c   : > { %v751_v43 = vpop.f32.mrf.mxu1 }
 0x12d   : > { %569 = vst [vmem:[%s1238_s18 + $0x10] sm:$0xff] %v750_v42 }
 0x12e   : > { %v752_v44 = vpop.f32.mrf.mxu1 }
 0x12f   : > { %v753_v45 = vadd.f32 %v752_v44, %v751_v43 }
 0x130   : > { %v754_v46 = vpop.f32.mrf.mxu1 }
 0x131   : > { %572 = vst [vmem:[%s1238_s18 + $0x28] sm:$0xff] %v753_v45 }
 0x132   : > { %v755_v47 = vpop.f32.mrf.mxu1 }
 0x133   : > { %v756_v48 = vadd.f32 %v755_v47, %v754_v46 }
 0x134   : > { %v757_v49 = vpop.f32.mrf.mxu1 }
 0x135   : > { %575 = vst [vmem:[%s1238_s18 + $0x40] sm:$0xff] %v756_v48 }
 0x136   : > { %v758_v50 = vpop.f32.mrf.mxu1 }
 0x137   : > { %v759_v51 = vadd.f32 %v758_v50, %v757_v49 }
 0x139   : > { %578 = vst [vmem:[%s1238_s18 + $0x58] sm:$0xff] %v759_v51 }
 0x143   : > { %v420_v52 = vpop.f32.mrf.mxu0 }
 0x144   : > { %567 = vst [vmem:[%s1238_s18] sm:$0xff] %v420_v52 }
 0x145   : > { %v422_v53 = vpop.f32.mrf.mxu0 }
 0x146   : > { %568 = vst [vmem:[%s1238_s18 + $0x8] sm:$0xff] %v422_v53 }
 0x147   : > { %v426_v54 = vpop.f32.mrf.mxu0 }
 0x148   : > { %570 = vst [vmem:[%s1238_s18 + $0x18] sm:$0xff] %v426_v54 }
 0x149   : > { %v428_v55 = vpop.f32.mrf.mxu0 }
 0x14a   : > { %571 = vst [vmem:[%s1238_s18 + $0x20] sm:$0xff] %v428_v55 }
 0x14b   : > { %v432_v56 = vpop.f32.mrf.mxu0 }
 0x14c   : > { %573 = vst [vmem:[%s1238_s18 + $0x30] sm:$0xff] %v432_v56 }
 0x14d   : > { %v434_v57 = vpop.f32.mrf.mxu0 }
 0x14e   : > { %574 = vst [vmem:[%s1238_s18 + $0x38] sm:$0xff] %v434_v57 }
 0x14f   : > { %v438_v58 = vpop.f32.mrf.mxu0 }
 0x150   : > { %576 = vst [vmem:[%s1238_s18 + $0x48] sm:$0xff] %v438_v58 }
 0x151   : > { %v440_v59 = vpop.f32.mrf.mxu0 }
 0x152   : > { %577 = vst [vmem:[%s1238_s18 + $0x50] sm:$0xff] %v440_v59 }
 0x153   : > { %911 = shalt.err (!%p908_p9)
}
 0x154   : > { %s912_s4 = scalar_lea.hbm %s1255_s30, 1536  ;;  %s916_s6 = scalar_lea.hbm %s1309_s2, 3072 }
 0x155   : > { %p913_p0 = scmp.ne.s32.totalorder %s1255_s30, %s912_s4  ;;  %p917_p6 = scmp.lt.s32.totalorder %s1255_s30, %s1309_s2 }
 0x156   : > { %p918_p10 = scmp.lt.s32.totalorder %s916_s6, %s912_s4 }
 0x157   : > { %p914_p1 = pnand %p913_p0, %p1331_p11 }
 0x158   : > { %p919_p2 = por %p918_p10, %p917_p6 }
 0x159   : > { %p915_p4 = pneg %p914_p1 }
 0x15b   : > { %p920_p12 = pnand %p919_p2, %p915_p4 }
 0x15d   : > { %923 = shalt.err (!%p920_p12)
}
 0x15e   : > { %s992_s16 = smov 384   ;;  %s993_s19 = smov 768  }
 0x15f   : > { %s994_s14 = smov 24  }
 0x160   : > { %769 = dma.vmem_to_hbm [thread:$0]  (%p1331_p11), %s1257_s23, 1536, %s1255_s30, %s580_s12, %s992_s16, %s993_s19, %s994_s14  }
 0x161 PF: > { %s1332_s18 = sld [smem:[#allocation13_spill]]  ;;  %s611_s27 = sand.u32 1, %s962_s9  }
 0x162   : > { %s1333_s20 = sld [smem:[#allocation12_spill]]  ;;  %s612_s24 = scalar_lea.sflag [#allocation5], %s611_s27 }
 0x167   : > { %p1334_p13 = scmp.ne.s32.totalorder %s1332_s18, 0 }
 0x168   : > { %p1335_p3 = scmp.ge.s32.totalorder %s1333_s20, 2 }
 0x16a   : > { %p780_p5 = pnand %p1335_p3, %p1334_p13 }
 0x16c   : > { %p781_p7 = pneg %p780_p5 }
 0x16e   : > { %957 = dma.done.wait (%p781_p7), %s612_s24, 1536  }
 0x16f   : > { %959 = vsyncadd (%p781_p7), %s612_s24, 4294965760  ;;  %s19_s14 = sadd.s32 1, %s1333_s20   ;;  %s1336_s9 = smov %s966_s10 }
 0x170   : > { %p16_p8 = scmp.ge.s32.totalorder %s19_s14, 4   ;;  %s1337_s10 = smov %s970_s11 }
 0x171   : > { %s1338_s11 = smov %s1118_s22  ;;  %s1339_s12 = smov %s978_s13 }
 0x172   : > { %s1340_s13 = smov %s1342_s28  ;;  %18 = sbr.rel (!%p16_p8) target bundleno = 7 (0x7), region = 87 }
 0x177   :  { %617 = vsyncpa [#allocation4], 1 }
 0x178   :  { %619 = vsyncpa [#allocation4 + $0x1], 1 }
 0x179   :  { %620 = vsyncpa [#allocation7], 1 }
 0x17a   :  { %622 = vsyncpa [#allocation7 + $0x1], 1 }
 0x17b   :  { %623 = vsyncpa [#allocation5], 1 }
 0x17c   :  { %625 = vsyncpa [#allocation5 + $0x1], 1 }

</bundles_post_ra>
